<compile_context>
chip_gen: v7x
topology: tpu7x:2x2x1
jax: 0.10.0
libtpu: 0.0.40
codegen_flags: <defaults>
</compile_context>

<pallas_src>
import math

import jax
import jax.numpy as jnp
from jax.experimental import pallas as pl
from jax.experimental.pallas import tpu as pltpu


def gcn_kernel(x_ref, idx_ref, w_ref, b_ref, o_ref):
    """One grid step processes TB batch rows, fully 2-D.

    x_ref  : [TB, S*F]   flattened node features               (VMEM)
    idx_ref: [TB, S]     int32 node indices                    (VMEM)
    w_ref  : [S*F, S*O]  folded weight kron(A.T, W)            (VMEM)
    b_ref  : [1, S*O]    f32 bias tiled over the S out slots   (VMEM)
    o_ref  : [TB, S*O]   output                                (VMEM)
    """
    S = idx_ref.shape[1]
    F = x_ref.shape[1] // S

    x = x_ref[...]                                   # [TB, S*F]
    idx = idx_ref[...]                               # [TB, S]

    # 1) In-VMEM gather: selected[:, m*F:(m+1)*F] = x[:, idx[:,m]*F : +F].
    #    Chained lane-broadcast selects (dtype-agnostic: no bf16 VPU math on
    #    v5e, exact for any dtype).  Out-of-range indices give zero rows.
    x_slots = [x[:, j * F:(j + 1) * F] for j in range(S)]      # hoisted slices
    zero_slot = jnp.zeros_like(x_slots[0])
    pieces = []
    for m in range(S):
        idx_m = idx[:, m:m + 1]                      # [TB, 1]
        acc = jnp.where(idx_m == 0, x_slots[0], zero_slot)
        for j in range(1, S):
            acc = jnp.where(idx_m == j, x_slots[j], acc)
        pieces.append(acc)                           # [TB, F]
    selected = jnp.concatenate(pieces, axis=1)       # [TB, S*F]

    # 2) Adjacency + weight folded into one MXU matmul, f32 accumulation,
    #    then bias add and a single lane-full 2-D store (last dim == S*O).
    out = jnp.dot(selected, w_ref[...], preferred_element_type=jnp.float32)
    o_ref[...] = (out + b_ref[...]).astype(o_ref.dtype)


def graph_convolution(input_feat, node_indices, graph_adj_matrix, weight, bias,
                      *, block_batch=2048):
    """Pallas GCN forward: gather + (adjacency∘weight) matmul + bias, in-kernel."""
    B, S, F = input_feat.shape
    N = graph_adj_matrix.shape[0]
    O = weight.shape[1]
    assert N == S, "aggregation via A @ (X W) requires node_num == seq_len"

    compute_dtype = jnp.promote_types(input_feat.dtype, weight.dtype)

    # Fold adjacency into the weight:  out_flat = selected_flat @ kron(A.T, W)
    #   kron(A.T, W)[m*F+f, s*O+o] == A[s, m] * W[f, o]
    w_big = jnp.kron(graph_adj_matrix.astype(jnp.float32).T,
                     weight.astype(jnp.float32)).astype(compute_dtype)  # [S*F, S*O]
    b_big = jnp.tile(bias.astype(jnp.float32), S).reshape(1, S * O)     # [1, S*O]

    x_flat = input_feat.reshape(B, S * F).astype(compute_dtype)         # [B, S*F]
    idx = node_indices.astype(jnp.int32)                                # [B, S]

    # Batch tiling: one block if the whole batch fits, else blocks of
    # `block_batch` rows (multiple of 8).  The last partial block is handled
    # by Pallas block-boundary masking -- no wrapper padding, no output slice.
    if B <= block_batch:
        TB, num_blocks = B, 1
    else:
        TB = (block_batch // 8) * 8
        num_blocks = pl.cdiv(B, TB)

    out_flat = pl.pallas_call(
        gcn_kernel,
        out_shape=jax.ShapeDtypeStruct((B, S * O), compute_dtype),
        grid_spec=pltpu.PrefetchScalarGridSpec(
            num_scalar_prefetch=0,
            grid=(num_blocks,),
            in_specs=[
                pl.BlockSpec((TB, S * F), lambda i: (i, 0)),     # features
                pl.BlockSpec((TB, S), lambda i: (i, 0)),         # indices
                pl.BlockSpec((S * F, S * O), lambda i: (0, 0)),  # kron(A.T, W)
                pl.BlockSpec((1, S * O), lambda i: (0, 0)),      # bias
            ],
            out_specs=pl.BlockSpec((TB, S * O), lambda i: (i, 0)),
        ),
        compiler_params=pltpu.CompilerParams(
            dimension_semantics=("parallel",),
            vmem_limit_bytes=48 * 1024 * 1024),
    )(x_flat, idx, w_big, b_big)

    # [B, S*O] -> [B, S, O]  (pure wrapper reshape, no padded slab, no slice).
    return out_flat.reshape(B, S, O)


def reference_jax(input_feat, node_indices, graph_adj_matrix, weight, bias):
    selected = jnp.take_along_axis(
        input_feat, node_indices[..., None].astype(jnp.int32), axis=1)
    support = jnp.einsum("bsf,fo->bso", selected, weight)
    aggregated = jnp.einsum("nm,bmo->bno", graph_adj_matrix, support)
    return aggregated + bias[None, None, :]


def init_params(key, in_features, out_features):
    """Deterministic xavier_uniform weight + zero bias (matches reset_parameters)."""
    limit = math.sqrt(6.0 / (in_features + out_features))
    weight = jax.random.uniform(
        key, (in_features, out_features), dtype=jnp.float32,
        minval=-limit, maxval=limit)
    bias = jnp.zeros((out_features,), dtype=jnp.float32)
    return weight, bias


if __name__ == "__main__":
    in_features = 4
    out_features = 8
    batch_size, seq_len, node_num = 2, 3, 3

    key = jax.random.PRNGKey(0)
    k_feat, k_w, k_feat2, k_idx2 = jax.random.split(key, 4)

    graph_adj_matrix = jnp.array(
        [[0, 1, 0], [1, 0, 1], [0, 1, 0]], dtype=jnp.float32)
    input_feat = jax.random.normal(
        k_feat, (batch_size, seq_len, in_features), dtype=jnp.float32)
    node_indices = jnp.array([[0, 1, 2], [1, 2, 0]], dtype=jnp.int32)

    weight, bias = init_params(k_w, in_features, out_features)

    # --- case 1: the module's own example shapes (f32, single block) --------
    out = jax.block_until_ready(
        graph_convolution(input_feat, node_indices, graph_adj_matrix,
                          weight, bias))
    ref = reference_jax(input_feat, node_indices, graph_adj_matrix,
                        weight, bias)
    assert out.shape == (batch_size, seq_len, out_features)
    assert jnp.allclose(out, ref, atol=1e-4, rtol=1e-4)

    # --- case 2: larger batch, small block_batch -> multi-block grid with a
    #             masked partial tail block (250 = 3*64 + 58) ---------------
    B2 = 250
    feat2 = jax.random.normal(k_feat2, (B2, seq_len, in_features),
                              dtype=jnp.float32)
    idx2 = jax.random.randint(k_idx2, (B2, seq_len), 0, node_num,
                              dtype=jnp.int32)
    out2 = jax.block_until_ready(
        graph_convolution(feat2, idx2, graph_adj_matrix, weight, bias,
                          block_batch=64))
    ref2 = reference_jax(feat2, idx2, graph_adj_matrix, weight, bias)
    assert out2.shape == (B2, seq_len, out_features)
    assert jnp.allclose(out2, ref2, atol=1e-4, rtol=1e-4)

    # --- case 3: bf16 operands, f32 accumulation (loose smoke tolerance) ----
    out3 = jax.block_until_ready(
        graph_convolution(feat2.astype(jnp.bfloat16), idx2, graph_adj_matrix,
                          weight.astype(jnp.bfloat16), bias))
    assert out3.dtype == jnp.bfloat16
    assert jnp.allclose(out3.astype(jnp.float32), ref2, atol=2e-1, rtol=2e-1)

    print("KERNEL_OK")
</pallas_src>

<mosaic_0001>
module attributes {stable_mosaic.version = 11 : i64} {
  func.func @gcn_kernel(%arg0: i32, %arg1: memref<2x12xf32, #tpu.memory_space<vmem>>, %arg2: memref<2x3xi32, #tpu.memory_space<vmem>>, %arg3: memref<12x24xf32, #tpu.memory_space<vmem>>, %arg4: memref<1x24xf32, #tpu.memory_space<vmem>>, %arg5: memref<2x24xf32, #tpu.memory_space<vmem>>) attributes {dimension_semantics = [#tpu.dimension_semantics<parallel>], iteration_bounds = array<i64: 1>, scalar_prefetch = 0 : i64, scratch_operands = 0 : i64, tpu.core_type = #tpu.core_type<tc>, window_params = [{transform_indices = @transform_0, window_bounds = array<i64: 2, 12>}, {transform_indices = @transform_1, window_bounds = array<i64: 2, 3>}, {pipeline_mode = #tpu.pipeline_mode<synchronous>, transform_indices = @transform_2, window_bounds = array<i64: 12, 24>}, {pipeline_mode = #tpu.pipeline_mode<synchronous>, transform_indices = @transform_3, window_bounds = array<i64: 1, 24>}, {transform_indices = @transform_4, window_bounds = array<i64: 2, 24>}]} {
    %c0 = arith.constant 0 : index
    %c0_0 = arith.constant 0 : index
    %0 = vector.load %arg1[%c0, %c0_0] : memref<2x12xf32, #tpu.memory_space<vmem>>, vector<2x12xf32>
    %c0_1 = arith.constant 0 : index
    %c0_2 = arith.constant 0 : index
    %1 = vector.load %arg2[%c0_1, %c0_2] : memref<2x3xi32, #tpu.memory_space<vmem>>, vector<2x3xi32>
    %2 = vector.extract_strided_slice %0 {offsets = [0, 0], sizes = [2, 4], strides = [1, 1]} : vector<2x12xf32> to vector<2x4xf32>
    %3 = vector.extract_strided_slice %0 {offsets = [0, 4], sizes = [2, 4], strides = [1, 1]} : vector<2x12xf32> to vector<2x4xf32>
    %4 = vector.extract_strided_slice %0 {offsets = [0, 8], sizes = [2, 4], strides = [1, 1]} : vector<2x12xf32> to vector<2x4xf32>
    %cst = arith.constant 0.000000e+00 : f32
    %5 = vector.broadcast %cst : f32 to vector<2x4xf32>
    %6 = vector.extract_strided_slice %1 {offsets = [0, 0], sizes = [2, 1], strides = [1, 1]} : vector<2x3xi32> to vector<2x1xi32>
    %c0_i32 = arith.constant 0 : i32
    %7 = vector.broadcast %c0_i32 : i32 to vector<2x1xi32>
    %8 = arith.cmpi eq, %6, %7 : vector<2x1xi32>
    %9 = vector.shape_cast %8 : vector<2x1xi1> to vector<2x1xi1>
    %10 = vector.broadcast %9 : vector<2x1xi1> to vector<2x4xi1>
    %11 = arith.select %10, %2, %5 : vector<2x4xi1>, vector<2x4xf32>
    %c1_i32 = arith.constant 1 : i32
    %12 = vector.broadcast %c1_i32 : i32 to vector<2x1xi32>
    %13 = arith.cmpi eq, %6, %12 : vector<2x1xi32>
    %14 = vector.shape_cast %13 : vector<2x1xi1> to vector<2x1xi1>
    %15 = vector.broadcast %14 : vector<2x1xi1> to vector<2x4xi1>
    %16 = arith.select %15, %3, %11 : vector<2x4xi1>, vector<2x4xf32>
    %c2_i32 = arith.constant 2 : i32
    %17 = vector.broadcast %c2_i32 : i32 to vector<2x1xi32>
    %18 = arith.cmpi eq, %6, %17 : vector<2x1xi32>
    %19 = vector.shape_cast %18 : vector<2x1xi1> to vector<2x1xi1>
    %20 = vector.broadcast %19 : vector<2x1xi1> to vector<2x4xi1>
    %21 = arith.select %20, %4, %16 : vector<2x4xi1>, vector<2x4xf32>
    %22 = vector.extract_strided_slice %1 {offsets = [0, 1], sizes = [2, 1], strides = [1, 1]} : vector<2x3xi32> to vector<2x1xi32>
    %c0_i32_3 = arith.constant 0 : i32
    %23 = vector.broadcast %c0_i32_3 : i32 to vector<2x1xi32>
    %24 = arith.cmpi eq, %22, %23 : vector<2x1xi32>
    %25 = vector.shape_cast %24 : vector<2x1xi1> to vector<2x1xi1>
    %26 = vector.broadcast %25 : vector<2x1xi1> to vector<2x4xi1>
    %27 = arith.select %26, %2, %5 : vector<2x4xi1>, vector<2x4xf32>
    %c1_i32_4 = arith.constant 1 : i32
    %28 = vector.broadcast %c1_i32_4 : i32 to vector<2x1xi32>
    %29 = arith.cmpi eq, %22, %28 : vector<2x1xi32>
    %30 = vector.shape_cast %29 : vector<2x1xi1> to vector<2x1xi1>
    %31 = vector.broadcast %30 : vector<2x1xi1> to vector<2x4xi1>
    %32 = arith.select %31, %3, %27 : vector<2x4xi1>, vector<2x4xf32>
    %c2_i32_5 = arith.constant 2 : i32
    %33 = vector.broadcast %c2_i32_5 : i32 to vector<2x1xi32>
    %34 = arith.cmpi eq, %22, %33 : vector<2x1xi32>
    %35 = vector.shape_cast %34 : vector<2x1xi1> to vector<2x1xi1>
    %36 = vector.broadcast %35 : vector<2x1xi1> to vector<2x4xi1>
    %37 = arith.select %36, %4, %32 : vector<2x4xi1>, vector<2x4xf32>
    %38 = vector.extract_strided_slice %1 {offsets = [0, 2], sizes = [2, 1], strides = [1, 1]} : vector<2x3xi32> to vector<2x1xi32>
    %c0_i32_6 = arith.constant 0 : i32
    %39 = vector.broadcast %c0_i32_6 : i32 to vector<2x1xi32>
    %40 = arith.cmpi eq, %38, %39 : vector<2x1xi32>
    %41 = vector.shape_cast %40 : vector<2x1xi1> to vector<2x1xi1>
    %42 = vector.broadcast %41 : vector<2x1xi1> to vector<2x4xi1>
    %43 = arith.select %42, %2, %5 : vector<2x4xi1>, vector<2x4xf32>
    %c1_i32_7 = arith.constant 1 : i32
    %44 = vector.broadcast %c1_i32_7 : i32 to vector<2x1xi32>
    %45 = arith.cmpi eq, %38, %44 : vector<2x1xi32>
    %46 = vector.shape_cast %45 : vector<2x1xi1> to vector<2x1xi1>
    %47 = vector.broadcast %46 : vector<2x1xi1> to vector<2x4xi1>
    %48 = arith.select %47, %3, %43 : vector<2x4xi1>, vector<2x4xf32>
    %c2_i32_8 = arith.constant 2 : i32
    %49 = vector.broadcast %c2_i32_8 : i32 to vector<2x1xi32>
    %50 = arith.cmpi eq, %38, %49 : vector<2x1xi32>
    %51 = vector.shape_cast %50 : vector<2x1xi1> to vector<2x1xi1>
    %52 = vector.broadcast %51 : vector<2x1xi1> to vector<2x4xi1>
    %53 = arith.select %52, %4, %48 : vector<2x4xi1>, vector<2x4xf32>
    %54 = tpu.concatenate %21, %37, %53 in 1 : vector<2x4xf32>, vector<2x4xf32>, vector<2x4xf32> -> vector<2x12xf32>
    %c0_9 = arith.constant 0 : index
    %c0_10 = arith.constant 0 : index
    %55 = vector.load %arg3[%c0_9, %c0_10] : memref<12x24xf32, #tpu.memory_space<vmem>>, vector<12x24xf32>
    %cst_11 = arith.constant dense<0.000000e+00> : vector<2x24xf32>
    %56 = tpu.matmul %54, %55, %cst_11 {dimension_numbers = #tpu.dot_dimension_numbers<[1], [0], [0], [1], [0, 0, 1, 1], [], []>} : vector<2x12xf32>, vector<12x24xf32>, vector<2x24xf32> -> vector<2x24xf32>
    %c0_12 = arith.constant 0 : index
    %c0_13 = arith.constant 0 : index
    %57 = vector.load %arg4[%c0_12, %c0_13] : memref<1x24xf32, #tpu.memory_space<vmem>>, vector<1x24xf32>
    %58 = vector.broadcast %57 : vector<1x24xf32> to vector<2x24xf32>
    %59 = arith.addf %56, %58 : vector<2x24xf32>
    %c0_14 = arith.constant 0 : index
    %c0_15 = arith.constant 0 : index
    %60 = vector.load %arg5[%c0_14, %c0_15] : memref<2x24xf32, #tpu.memory_space<vmem>>, vector<2x24xf32>
    tpu.vector_store %arg5[%c0_14, %c0_15], %59 {strides = array<i32>} : memref<2x24xf32, #tpu.memory_space<vmem>>, vector<2x24xf32>,
    return
  }
  func.func @transform_0(%arg0: i32) -> (i32, i32) {
    %c0_i32 = arith.constant 0 : i32
    %c0_i32_0 = arith.constant 0 : i32
    return %arg0, %c0_i32 : i32, i32
  }
  func.func @transform_1(%arg0: i32) -> (i32, i32) {
    %c0_i32 = arith.constant 0 : i32
    %c0_i32_0 = arith.constant 0 : i32
    return %arg0, %c0_i32 : i32, i32
  }
  func.func @transform_2(%arg0: i32) -> (i32, i32) {
    %c0_i32 = arith.constant 0 : i32
    %c0_i32_0 = arith.constant 0 : i32
    %c0_i32_1 = arith.constant 0 : i32
    return %c0_i32, %c0_i32_0 : i32, i32
  }
  func.func @transform_3(%arg0: i32) -> (i32, i32) {
    %c0_i32 = arith.constant 0 : i32
    %c0_i32_0 = arith.constant 0 : i32
    %c0_i32_1 = arith.constant 0 : i32
    return %c0_i32, %c0_i32_0 : i32, i32
  }
  func.func @transform_4(%arg0: i32) -> (i32, i32) {
    %c0_i32 = arith.constant 0 : i32
    %c0_i32_0 = arith.constant 0 : i32
    return %arg0, %c0_i32 : i32, i32
  }
}

</mosaic_0001>

<bundles_post_ra>
// kernel: tpu_custom_call.1
= control target key start
LH: loop header
LB: loop body
LE: loop exit
PB: predicated region body
PF: predicated region fallthrough
CT: control target
= control target key end

     0   :  { %9 = vsyncpa [#allocation3], 0  ;;  %s457_s0 = inlined_call_operand.hbm [shape: f32[2,12], index: 0, kind: input, shape index: {}]   ;;  %s458_s1 = inlined_call_operand.vmem [shape: s32[2,3], index: 1, kind: input, shape index: {}]   ;;  %s459_s2 = inlined_call_operand.hbm [shape: f32[12,24], index: 2, kind: input, shape index: {}]   ;;  %s460_s3 = inlined_call_operand.vmem [shape: f32[1,24], index: 3, kind: input, shape index: {}]   ;;  %s461_s4 = inlined_call_operand.hbm [shape: f32[2,24], index: 4, kind: output, shape index: {}]  }
   0x1   :  { %10 = vsyncpa [#allocation6], 0 }
   0x2   :  { %11 = vsyncpa [#allocation4], 0  ;;  %s351_s15 = smov [#allocation2]   ;;  %s352_s17 = smov [#allocation5]  }
   0x3   :  { %s18_s16 = sshll.u32 %s351_s15, 4  ;;  %s29_s18 = sshll.u32 %s352_s17, 4  ;;  %s19_s16 = int_to_ptr.vmem [resolvable:$true] %s18_s16  ;;  %s391_s18 = int_to_ptr.vmem [resolvable:$true] %s29_s18 }
   0x4   :  { %s279_s21 = scalar_lea.hbm %s457_s0, 32 }
   0x5   :  { %p280_p0 = scmp.ne.s32.totalorder %s457_s0, %s279_s21  ;;  %p283_p1 = scmp.lt.u32.totalorder %s279_s21, %s457_s0 }
   0x7   :  { %p285_p2 = pnand %p283_p1, %p280_p0 }
   0x9   :  { %288 = shalt.err (!%p285_p2)
}
   0xa   :  { %s289_s26 = scalar_lea.vmem %s19_s16, 32  ;;  %p294_p4 = scmp.lt.s32.totalorder %s19_s16, %s19_s16 }
   0xb   :  { %p290_p3 = scmp.ne.s32.totalorder %s19_s16, %s289_s26  ;;  %p295_p5 = scmp.lt.s32.totalorder %s289_s26, %s289_s26 }
   0xd   :  { %p296_p6 = por %p295_p5, %p294_p4 }
   0xf   :  { %p297_p7 = pnand %p296_p6, %p290_p3 }
  0x11   :  { %300 = shalt.err (!%p297_p7)
}
  0x12   :  { %21 = dma.hbm_to_vmem [thread:$0]  %s457_s0, 32, %s19_s16, [#allocation3]  }
  0x13   :  { %s301_s5 = scalar_lea.hbm %s459_s2, 256 }
  0x14   :  { %p302_p8 = scmp.ne.s32.totalorder %s459_s2, %s301_s5  ;;  %p305_p9 = scmp.lt.u32.totalorder %s301_s5, %s459_s2 }
  0x16   :  { %p307_p10 = pnand %p305_p9, %p302_p8 }
  0x18   :  { %310 = shalt.err (!%p307_p10)
}
  0x19   :  { %s311_s10 = scalar_lea.vmem %s391_s18, 256  ;;  %p316_p12 = scmp.lt.s32.totalorder %s391_s18, %s391_s18 }
  0x1a   :  { %p312_p11 = scmp.ne.s32.totalorder %s391_s18, %s311_s10  ;;  %p317_p13 = scmp.lt.s32.totalorder %s311_s10, %s311_s10 }
  0x1c   :  { %p318_p0 = por %p317_p13, %p316_p12 }
  0x1e   :  { %p319_p1 = pnand %p318_p0, %p312_p11 }
  0x20   :  { %322 = shalt.err (!%p319_p1)
}
  0x21   :  { %s353_s0 = smov 128   ;;  %s354_s11 = smov 8  }
  0x22   :  { %35 = dma.hbm_to_vmem [thread:$0]  %s459_s2, 256, %s391_s18, [#allocation6], %s353_s0, %s353_s0, %s354_s11  }
  0x23   :  { %345 = dma.done.wait [#allocation3], 32  }
  0x24   :  { %346 = vsyncadd [#allocation3], 4294967264 }
  0x25   :  { %347 = dma.done.wait [#allocation6], 256  }
  0x26   :  { %348 = vsyncadd [#allocation6], 4294967040  ;;  %v355_v0 = vmov 0   ;;  %v45_v1 = vld [vmem:[%s458_s1] sm:$0x3]  ;;  %v356_v4 = vmov 1  }
  0x27   :  { %270 = vset.pattern.permute.xlu0 %v355_v0  ;;  %272 = vset.pattern.permute.xlu1 %v355_v0  ;;  %vm46_vm0 = vcmp.eq.s32.totalorder %v45_v1, 0  ;;  %vm53_vm1 = vcmp.eq.s32.totalorder %v45_v1, 1  ;;  %vm64_vm2 = vcmp.eq.s32.totalorder %v45_v1, 2  ;;  %v357_v6 = vmov 2   ;;  %v425_v7 = vld [vmem:[#allocation2] sm:$0x3] }
  0x28   :  { %v47_v2 = vsel %vm46_vm0, 1, %v355_v0  ;;  %v54_v3 = vsel %vm53_vm1, 1, %v355_v0  ;;  %v65_v5 = vsel %vm64_vm2, 1, %v355_v0  ;;  %s358_s1 = smov 4   ;;  %v133_v20 = vld [vmem:[#allocation5] sm:$0xff]  ;;  %vm146_vm8 = vcmask 1043456  }
  0x29   :  { %49 = vperm.xlu0 %270, %v47_v2   ;;  %56 = vperm.xlu1 %272, %v54_v3   ;;  %v134_v21 = vld [vmem:[#allocation5 + $0x8] sm:$0xf]  ;;  %v359_v24 = vmov 0.0|0.0   ;;  %vm360_vm9 = vmmov 1   ;;  %vm361_vm11 = vmmov 0   ;;  %v362_v26 = vmov 0.0  }
  0x2a   :  { %251 = vmatprep.subr.bf16.mxu0 %v359_v24  ;;  %v252_v25 = vpack.c.bf16 %v134_v21, %v133_v20  ;;  %vm253_vm10 = vmpackc.low %vm146_vm8, %vm360_vm9  ;;  %248 = vmatprep.mubr.msk.f32.mxu0 %vm361_vm11, %v362_v26  ;;  %s363_s2 = smov 120   ;;  %s364_s16 = smov 124   ;;  %vm129_vm15 = vcmask 31744   ;;  %vm131_vm0 = vcmask 64512   ;;  %vm142_vm2 = vcmask 97280  }
  0x2b   :  { %v238_v41 = vld [vmem:[%s460_s3] ss:$0 sm:$0xff]  ;;  %s365_s19 = smov [#allocation7]  }
  0x2c   :  { %254 = vmatpush3.bf16.msk.msra.mxu0 %vm253_vm10, %v252_v25  ;;  %s228_s20 = sshll.u32 %s365_s19, 4  ;;  %s229_s20 = int_to_ptr.vmem [resolvable:$true] %s228_s20 }
  0x2d   :  { %271 = vset.pattern.permute.xlu0 %v356_v4  ;;  %273 = vset.pattern.permute.xlu1 %v356_v4  ;;  %s323_s21 = scalar_lea.vmem %s229_s20, 32  ;;  %p328_p3 = scmp.lt.s32.totalorder %s229_s20, %s229_s20 }
  0x2e   :  { %76 = vperm.xlu0 %271, %v47_v2   ;;  %81 = vperm.xlu1 %273, %v54_v3   ;;  %p324_p2 = scmp.ne.s32.totalorder %s229_s20, %s323_s21  ;;  %p329_p4 = scmp.lt.s32.totalorder %s323_s21, %s323_s21 }
  0x30   :  { %p330_p5 = por %p329_p4, %p328_p3 }
  0x32   :  { %274 = vset.pattern.permute.xlu1 %v357_v6  ;;  %275 = vset.pattern.permute.xlu0 %v355_v0  ;;  %p331_p6 = pnand %p330_p5, %p324_p2 }
  0x33   :  { %99 = vperm.xlu1 %274, %v47_v2  }
  0x37   :  { %276 = vset.pattern.permute.xlu1 %v356_v4 }
  0xa8   :  { %v50_v8 = vpop.permute.xlu0 %49  ;;  %v57_v12 = vpop.permute.xlu1 %56 }
  0xa9   :  { %vm51_vm3 = vcmp.eq.s32.totalorder %v50_v8, 1  ;;  %vm58_vm5 = vcmp.eq.s32.totalorder %v57_v12, 1 }
  0xaa   :  { %v52_v9 = vsel %vm51_vm3, %v425_v7, 0.0  ;;  %vm220_vm3 = vcmask 189440  }
  0xab   :  { %60 = vrot.lane.b32.xlu0 %v52_v9, %s358_s1 }
  0xad   :  { %v77_v10 = vpop.permute.xlu0 %76  ;;  %v82_v13 = vpop.permute.xlu1 %81 }
  0xae   :  { %vm78_vm4 = vcmp.eq.s32.totalorder %v77_v10, 1  ;;  %vm83_vm7 = vcmp.eq.s32.totalorder %v82_v13, 1 }
  0xaf   :  { %v79_v11 = vsel %vm78_vm4, %v425_v7, 0.0  ;;  %67 = vperm.xlu0 %275, %v65_v5  }
  0xb0   :  { %85 = vrot.lane.b32.xlu1 %v79_v11, %s358_s1 }
  0xb2   :  { %v100_v14 = vpop.permute.xlu1 %99 }
  0xb3   :  { %278 = vset.pattern.permute.xlu0 %v357_v6  ;;  %vm101_vm6 = vcmp.eq.s32.totalorder %v100_v14, 1 }
  0xb4   :  { %90 = vperm.xlu1 %276, %v65_v5   ;;  %v102_v17 = vsel %vm101_vm6, %v425_v7, 0.0 }
  0xb8   :  { %277 = vset.pattern.permute.xlu1 %v357_v6 }
  0xb9   :  { %104 = vperm.xlu1 %277, %v54_v3  }
 0x11d   :  { %v61_v15 = vpop.permute.xlu0 %60 }
 0x11e   :  { %v63_v16 = vsel %vm58_vm5, %v425_v7, %v61_v15 }
 0x11f   :  { %71 = vrot.lane.b32.xlu0 %v63_v16, %s358_s1 }
 0x122   :  { %v86_v18 = vpop.permute.xlu1 %85 }
 0x123   :  { %108 = vrot.lane.b32.xlu0 %v102_v17, %s358_s1  ;;  %v88_v19 = vsel %vm83_vm7, %v425_v7, %v86_v18 }
 0x124   :  { %94 = vrot.lane.b32.xlu1 %v88_v19, %s358_s1 }
 0x128   :  { %113 = vperm.xlu1 %277, %v65_v5  }
 0x12e   :  { %v68_v22 = vpop.permute.xlu0 %67 }
 0x12f   :  { %vm69_vm12 = vcmp.eq.s32.totalorder %v68_v22, 1 }
 0x133   :  { %v91_v23 = vpop.permute.xlu1 %90 }
 0x134   :  { %vm92_vm14 = vcmp.eq.s32.totalorder %v91_v23, 1 }
 0x138   :  { %v105_v28 = vpop.permute.xlu1 %104 }
 0x139   :  { %vm106_vm13 = vcmp.eq.s32.totalorder %v105_v28, 1 }
 0x191   :  { %v72_v27 = vpop.permute.xlu0 %71 }
 0x192   :  { %v74_v29 = vsel %vm69_vm12, %v425_v7, %v72_v27 }
 0x193   :  { %122 = vrot.lane.b32.xlu1 %v74_v29, %s363_s2 }
 0x195   :  { %v109_v30 = vpop.permute.xlu0 %108 }
 0x196   :  { %v111_v31 = vsel %vm106_vm13, %v425_v7, %v109_v30  ;;  %v95_v32 = vpop.permute.xlu1 %94 }
 0x197   :  { %117 = vrot.lane.b32.xlu0 %v111_v31, %s358_s1  ;;  %v97_v33 = vsel %vm92_vm14, %v425_v7, %v95_v32 }
 0x19b   :  { %126 = vrot.lane.b32.xlu0 %v97_v33, %s364_s16 }
 0x1a7   :  { %v114_v34 = vpop.permute.xlu1 %113 }
 0x1a8   :  { %vm115_vm1 = vcmp.eq.s32.totalorder %v114_v34, 1 }
 0x205   :  { %v123_v36 = vpop.permute.xlu1 %122 }
 0x209   :  { %v118_v35 = vpop.permute.xlu0 %117 }
 0x20a   :  { %v120_v38 = vsel %vm115_vm1, %v425_v7, %v118_v35 }
 0x20d   :  { %v127_v37 = vpop.permute.xlu0 %126 }
 0x20e   :  { %v130_v39 = vsel %vm129_vm15, %v123_v36, %v127_v37 }
 0x20f   :  { %v132_v40 = vsel %vm131_vm0, %v130_v39, %v120_v38 }
 0x210   :  { %249 = vmatmul.mubr.msk.f32.vlgmr.msra.gmra.mrb[0].mxu0 %vm142_vm2, %v132_v40 }
 0x2e3   :  { %v216_v42 = vpop.f32.mrb[0].mxu0 }
 0x2e4   :  { %v217_v43 = vadd.f32 %v238_v41, %v216_v42  ;;  %v250_v44 = vpop.f32.mrb[1].mxu0 }
 0x2e6   :  { %221 = vst.msk [vmem:[#allocation7] sm:$0x3] %vm220_vm3, %v217_v43 }
 0x2e7   :  { %334 = shalt.err (!%p331_p6)
}
 0x2e8   :  { %s335_s24 = scalar_lea.hbm %s461_s4, 32 }
 0x2e9   :  { %p336_p7 = scmp.ne.s32.totalorder %s461_s4, %s335_s24  ;;  %p339_p8 = scmp.lt.u32.totalorder %s335_s24, %s461_s4 }
 0x2eb   :  { %p341_p9 = pnand %p339_p8, %p336_p7 }
 0x2ed   :  { %344 = shalt.err (!%p341_p9)
}
 0x2ee   :  { %231 = dma.vmem_to_hbm [thread:$0]  %s229_s20, 32, %s461_s4, [#allocation4]  }
 0x2ef   :  { %349 = dma.done.wait [#allocation4], 32  }
 0x2f0   :  { %350 = vsyncadd [#allocation4], 4294967264 }
 0x2f1   :  { %235 = vsyncpa [#allocation3], 1 }
 0x2f2   :  { %236 = vsyncpa [#allocation6], 1 }
 0x2f3   :  { %237 = vsyncpa [#allocation4], 1 }

</bundles_post_ra>
